<compile_context>
chip_gen: v5e
topology: v5e:2x2
jax: 0.10.0
libtpu: 0.0.40
codegen_flags: <defaults>
</compile_context>

<pallas_src>
import functools

import jax
import jax.numpy as jnp
from jax import lax
from jax.experimental import pallas as pl
from jax.experimental.pallas import tpu as pltpu


def _shallow_lstm_kernel(x_ref, w_in_ref, b_in_ref, w_rec_ref,
                         fcw_ref, fcb_ref, out_ref, addend_ref,
                         *, seq_len, hidden_size, batch_pad):
    T, H, Bp = seq_len, hidden_size, batch_pad
    H2 = 2 * H

    # ---- Prologue (off the serial chain) --------------------------------
    # Layer-0 input projection for ALL timesteps in one dense matmul, written
    # to a VMEM scratch shaped (T*Bp, 8H) in the interleaved gate layout
    # [i0 i1 | f0 f1 | g0 g1 | o0 o1]; layer-1 positions hold only b1.
    addend_ref[...] = (
        jnp.dot(x_ref[...], w_in_ref[...], preferred_element_type=jnp.float32)
        + b_in_ref[...])

    w_rec = w_rec_ref[...]            # (2H, 8H) fused/interleaved recurrent weight

    # ---- Peel t = 0: layer-0 cell only (h1_{-1} = c1_{-1} = 0) ----------
    g0 = addend_ref[pl.ds(0, Bp), :]                       # (Bp, 8H)
    t0 = jnp.tanh(g0)                                      # one EUP pass
    i0 = 0.5 * t0[:, 0 * H:1 * H] + 0.5                    # sigmoid via tanh
    gg = t0[:, 4 * H:5 * H]
    o0 = 0.5 * t0[:, 6 * H:7 * H] + 0.5
    c0 = i0 * gg                                           # c_prev = 0
    h0 = o0 * jnp.tanh(c0)
    zeros_h = jnp.zeros((Bp, H), jnp.float32)
    c_joint = jnp.concatenate([c0, zeros_h], axis=-1)      # [c0 | c1], (Bp, 2H)
    h_joint = jnp.concatenate([h0, zeros_h], axis=-1)      # [h0 | h1]
    fused = jnp.dot(h_joint, w_rec, preferred_element_type=jnp.float32)

    # ---- Steady state: one fused MXU push per timestep ------------------
    # Iteration t computes layer-0 cell for step t and layer-1 cell for step
    # t-1 jointly (they are independent, so their EUP pushes pipeline).
    for t in range(1, T):
        gates = addend_ref[pl.ds(t * Bp, Bp), :] + fused   # (Bp, 8H)
        tj = jnp.tanh(gates)                               # 2 vregs, pipelined
        i_g = 0.5 * tj[:, 0 * H2:1 * H2] + 0.5
        f_g = 0.5 * tj[:, 1 * H2:2 * H2] + 0.5
        g_g = tj[:, 2 * H2:3 * H2]
        o_g = 0.5 * tj[:, 3 * H2:4 * H2] + 0.5
        c_joint = f_g * c_joint + i_g * g_g
        h_joint = o_g * jnp.tanh(c_joint)                  # = [h0_t | h1_{t-1}]
        fused = jnp.dot(h_joint, w_rec, preferred_element_type=jnp.float32)

    # ---- Epilogue: layer-1 cell for the final timestep, then FC head -----
    ge = fused + b_in_ref[...]                 # only layer-1 lanes are used
    te = jnp.tanh(ge)
    i1 = 0.5 * te[:, 1 * H:2 * H] + 0.5
    f1 = 0.5 * te[:, 3 * H:4 * H] + 0.5
    g1 = te[:, 5 * H:6 * H]
    o1 = 0.5 * te[:, 7 * H:8 * H] + 0.5
    c1 = f1 * c_joint[:, H:H2] + i1 * g1
    h1 = o1 * jnp.tanh(c1)                                 # (Bp, H)

    # FC (H -> 1): VPU multiply + lane reduction.
    out_ref[...] = (jnp.sum(h1 * fcw_ref[...], axis=-1, keepdims=True)
                    + fcb_ref[...])


def shallow_lstm_forward(x, params):
    """x: (B, T, I) float32 (batch_first). Returns (B, 1) float32."""
    B, T, I = x.shape
    H = params["whh0"].shape[0]
    assert (8 * H) % 128 == 0, "8H should be lane-aligned for cheap gate slicing"
    Bp = max(8, ((B + 7) // 8) * 8)      # pad batch to full sublanes (free)

    # --- Wrapper does layout plumbing only (all FLOPs stay in the kernel) ---
    # Pre-scale i/f/o gate columns by 0.5 so sigmoid(x)=0.5*tanh(x/2)+0.5
    # shares the single in-kernel tanh with the g gate.
    gate_scale = jnp.repeat(jnp.array([0.5, 0.5, 1.0, 0.5], jnp.float32), H)[None, :]
    wih0 = params["wih0"] * gate_scale
    whh0 = params["whh0"] * gate_scale
    b0 = params["b0"] * gate_scale
    wih1 = params["wih1"] * gate_scale
    whh1 = params["whh1"] * gate_scale
    b1 = params["b1"] * gate_scale

    def interleave(l0, l1):
        # (R, 4H) x2 -> (R, 8H) with column order [i0 i1 | f0 f1 | g0 g1 | o0 o1]
        R = l0.shape[0]
        return jnp.stack([l0.reshape(R, 4, H), l1.reshape(R, 4, H)],
                         axis=2).reshape(R, 8 * H)

    zeros_i4h = jnp.zeros((I, 4 * H), jnp.float32)
    zeros_h4h = jnp.zeros((H, 4 * H), jnp.float32)
    w_in = interleave(wih0, zeros_i4h)                         # (I, 8H)
    b_in = interleave(b0, b1)                                  # (1, 8H)
    w_rec = jnp.concatenate([interleave(whh0, wih1),           # rows for h0
                             interleave(zeros_h4h, whh1)],     # rows for h1
                            axis=0)                            # (2H, 8H)
    fcw_row = params["fcw"].T                                  # (1, H)

    # Time-major flatten with batch padded to Bp sublanes.
    x_tm = jnp.transpose(x, (1, 0, 2))                         # (T, B, I)
    x_tm = jnp.pad(x_tm, ((0, 0), (0, Bp - B), (0, 0)))        # (T, Bp, I)
    x_flat = x_tm.reshape(T * Bp, I)

    kernel = functools.partial(_shallow_lstm_kernel, seq_len=T,
                               hidden_size=H, batch_pad=Bp)
    vmem = pl.BlockSpec(memory_space=pltpu.MemorySpace.VMEM)
    out = pl.pallas_call(
        kernel,
        out_shape=jax.ShapeDtypeStruct((Bp, 1), jnp.float32),
        in_specs=[vmem] * 6,
        out_specs=vmem,
        scratch_shapes=[pltpu.VMEM((T * Bp, 8 * H), jnp.float32)],
    )(x_flat, w_in, b_in, w_rec, fcw_row, params["fcb"])
    return out[:B]


def make_params(key, input_size, hidden_size):
    """Deterministic init matching PyTorch shapes (stored pre-transposed)."""
    H = hidden_size
    scale = 1.0 / jnp.sqrt(jnp.float32(H))
    ks = jax.random.split(key, 10)
    u = lambda k, shape: jax.random.uniform(
        k, shape, jnp.float32, minval=-scale, maxval=scale)
    # PyTorch nn.LSTM stores W_ih: (4H, in), W_hh: (4H, H); we keep transposes.
    return {
        "wih0": u(ks[0], (input_size, 4 * H)),
        "whh0": u(ks[1], (H, 4 * H)),
        "b0":   u(ks[2], (1, 4 * H)) + u(ks[3], (1, 4 * H)),  # b_ih + b_hh
        "wih1": u(ks[4], (H, 4 * H)),
        "whh1": u(ks[5], (H, 4 * H)),
        "b1":   u(ks[6], (1, 4 * H)) + u(ks[7], (1, 4 * H)),
        "fcw":  u(ks[8], (H, 1)),
        "fcb":  u(ks[9], (1, 1)),
    }


def shallow_lstm_reference(x, params):
    """Pure-JAX reference (lax.scan) mirroring PyTorch nn.LSTM semantics."""
    B, T, I = x.shape
    H = params["whh0"].shape[0]

    def cell(x_t, h_prev, c_prev, w_ih, w_hh, b):
        gates = x_t @ w_ih + h_prev @ w_hh + b
        i_g = jax.nn.sigmoid(gates[:, 0 * H:1 * H])
        f_g = jax.nn.sigmoid(gates[:, 1 * H:2 * H])
        g_g = jnp.tanh(gates[:, 2 * H:3 * H])
        o_g = jax.nn.sigmoid(gates[:, 3 * H:4 * H])
        c_new = f_g * c_prev + i_g * g_g
        h_new = o_g * jnp.tanh(c_new)
        return h_new, c_new

    def step(carry, x_t):
        h0, c0, h1, c1 = carry
        h0, c0 = cell(x_t, h0, c0, params["wih0"], params["whh0"], params["b0"])
        h1, c1 = cell(h0, h1, c1, params["wih1"], params["whh1"], params["b1"])
        return (h0, c0, h1, c1), h1

    z = jnp.zeros((B, H), jnp.float32)
    (_, _, h1, _), _ = lax.scan(step, (z, z, z, z), jnp.transpose(x, (1, 0, 2)))
    return h1 @ params["fcw"] + params["fcb"]


if __name__ == "__main__":
    # Small shapes consistent with the module's forward (B, T, input_size).
    B, T, I, H = 2, 8, 64, 32

    key = jax.random.PRNGKey(0)
    k_x, k_p = jax.random.split(key)
    x = jax.random.normal(k_x, (B, T, I), jnp.float32)
    params = make_params(k_p, I, H)

    out = jax.block_until_ready(shallow_lstm_forward(x, params))
    ref = jax.block_until_ready(shallow_lstm_reference(x, params))

    assert out.shape == (B, 1)
    assert jnp.allclose(out, ref, atol=2e-4, rtol=2e-4), (out, ref)

    print("KERNEL_OK")
</pallas_src>

<mosaic_0001>
module attributes {stable_mosaic.version = 11 : i64} {
  func.func @_shallow_lstm_kernel(%arg0: memref<64x64xf32, #tpu.memory_space<vmem>>, %arg1: memref<64x256xf32, #tpu.memory_space<vmem>>, %arg2: memref<1x256xf32, #tpu.memory_space<vmem>>, %arg3: memref<64x256xf32, #tpu.memory_space<vmem>>, %arg4: memref<1x32xf32, #tpu.memory_space<vmem>>, %arg5: memref<1x1xf32, #tpu.memory_space<vmem>>, %arg6: memref<8x1xf32, #tpu.memory_space<vmem>>, %arg7: memref<64x256xf32, #tpu.memory_space<vmem>>) attributes {dimension_semantics = [], scalar_prefetch = 0 : i64, scratch_operands = 1 : i64, tpu.core_type = #tpu.core_type<tc>} {
    %c0 = arith.constant 0 : index
    %c0_0 = arith.constant 0 : index
    %0 = vector.load %arg0[%c0, %c0_0] : memref<64x64xf32, #tpu.memory_space<vmem>>, vector<64x64xf32>
    %c0_1 = arith.constant 0 : index
    %c0_2 = arith.constant 0 : index
    %1 = vector.load %arg1[%c0_1, %c0_2] : memref<64x256xf32, #tpu.memory_space<vmem>>, vector<64x256xf32>
    %cst = arith.constant dense<0.000000e+00> : vector<64x256xf32>
    %2 = tpu.matmul %0, %1, %cst {dimension_numbers = #tpu.dot_dimension_numbers<[1], [0], [0], [1], [0, 0, 1, 1], [], []>} : vector<64x64xf32>, vector<64x256xf32>, vector<64x256xf32> -> vector<64x256xf32>
    %c0_3 = arith.constant 0 : index
    %c0_4 = arith.constant 0 : index
    %3 = vector.load %arg2[%c0_3, %c0_4] : memref<1x256xf32, #tpu.memory_space<vmem>>, vector<1x256xf32>
    %4 = vector.broadcast %3 : vector<1x256xf32> to vector<64x256xf32>
    %5 = arith.addf %2, %4 : vector<64x256xf32>
    %c0_5 = arith.constant 0 : index
    %c0_6 = arith.constant 0 : index
    %6 = vector.load %arg7[%c0_5, %c0_6] : memref<64x256xf32, #tpu.memory_space<vmem>>, vector<64x256xf32>
    tpu.vector_store %arg7[%c0_5, %c0_6], %5 {strides = array<i32>} : memref<64x256xf32, #tpu.memory_space<vmem>>, vector<64x256xf32>,
    %c0_7 = arith.constant 0 : index
    %c0_8 = arith.constant 0 : index
    %7 = vector.load %arg3[%c0_7, %c0_8] : memref<64x256xf32, #tpu.memory_space<vmem>>, vector<64x256xf32>
    %c0_9 = arith.constant 0 : index
    %c0_10 = arith.constant 0 : index
    %8 = vector.load %arg7[%c0_9, %c0_10] : memref<64x256xf32, #tpu.memory_space<vmem>>, vector<8x256xf32>
    %9 = math.tanh %8 : vector<8x256xf32>
    %10 = vector.extract_strided_slice %9 {offsets = [0, 0], sizes = [8, 32], strides = [1, 1]} : vector<8x256xf32> to vector<8x32xf32>
    %cst_11 = arith.constant 5.000000e-01 : f32
    %11 = vector.broadcast %cst_11 : f32 to vector<8x32xf32>
    %12 = arith.mulf %11, %10 : vector<8x32xf32>
    %cst_12 = arith.constant 5.000000e-01 : f32
    %13 = vector.broadcast %cst_12 : f32 to vector<8x32xf32>
    %14 = arith.addf %12, %13 : vector<8x32xf32>
    %15 = vector.extract_strided_slice %9 {offsets = [0, 128], sizes = [8, 32], strides = [1, 1]} : vector<8x256xf32> to vector<8x32xf32>
    %16 = vector.extract_strided_slice %9 {offsets = [0, 192], sizes = [8, 32], strides = [1, 1]} : vector<8x256xf32> to vector<8x32xf32>
    %cst_13 = arith.constant 5.000000e-01 : f32
    %17 = vector.broadcast %cst_13 : f32 to vector<8x32xf32>
    %18 = arith.mulf %17, %16 : vector<8x32xf32>
    %cst_14 = arith.constant 5.000000e-01 : f32
    %19 = vector.broadcast %cst_14 : f32 to vector<8x32xf32>
    %20 = arith.addf %18, %19 : vector<8x32xf32>
    %21 = arith.mulf %14, %15 : vector<8x32xf32>
    %22 = math.tanh %21 : vector<8x32xf32>
    %23 = arith.mulf %20, %22 : vector<8x32xf32>
    %cst_15 = arith.constant 0.000000e+00 : f32
    %24 = vector.broadcast %cst_15 : f32 to vector<8x32xf32>
    %25 = tpu.concatenate %21, %24 in 1 : vector<8x32xf32>, vector<8x32xf32> -> vector<8x64xf32>
    %26 = tpu.concatenate %23, %24 in 1 : vector<8x32xf32>, vector<8x32xf32> -> vector<8x64xf32>
    %cst_16 = arith.constant dense<0.000000e+00> : vector<8x256xf32>
    %27 = tpu.matmul %26, %7, %cst_16 {dimension_numbers = #tpu.dot_dimension_numbers<[1], [0], [0], [1], [0, 0, 1, 1], [], []>} : vector<8x64xf32>, vector<64x256xf32>, vector<8x256xf32> -> vector<8x256xf32>
    %c8 = arith.constant 8 : index
    %c0_17 = arith.constant 0 : index
    %28 = vector.load %arg7[%c8, %c0_17] : memref<64x256xf32, #tpu.memory_space<vmem>>, vector<8x256xf32>
    %29 = arith.addf %28, %27 : vector<8x256xf32>
    %30 = math.tanh %29 : vector<8x256xf32>
    %31 = vector.extract_strided_slice %30 {offsets = [0, 0], sizes = [8, 64], strides = [1, 1]} : vector<8x256xf32> to vector<8x64xf32>
    %cst_18 = arith.constant 5.000000e-01 : f32
    %32 = vector.broadcast %cst_18 : f32 to vector<8x64xf32>
    %33 = arith.mulf %32, %31 : vector<8x64xf32>
    %cst_19 = arith.constant 5.000000e-01 : f32
    %34 = vector.broadcast %cst_19 : f32 to vector<8x64xf32>
    %35 = arith.addf %33, %34 : vector<8x64xf32>
    %36 = vector.extract_strided_slice %30 {offsets = [0, 64], sizes = [8, 64], strides = [1, 1]} : vector<8x256xf32> to vector<8x64xf32>
    %cst_20 = arith.constant 5.000000e-01 : f32
    %37 = vector.broadcast %cst_20 : f32 to vector<8x64xf32>
    %38 = arith.mulf %37, %36 : vector<8x64xf32>
    %cst_21 = arith.constant 5.000000e-01 : f32
    %39 = vector.broadcast %cst_21 : f32 to vector<8x64xf32>
    %40 = arith.addf %38, %39 : vector<8x64xf32>
    %41 = vector.extract_strided_slice %30 {offsets = [0, 128], sizes = [8, 64], strides = [1, 1]} : vector<8x256xf32> to vector<8x64xf32>
    %42 = vector.extract_strided_slice %30 {offsets = [0, 192], sizes = [8, 64], strides = [1, 1]} : vector<8x256xf32> to vector<8x64xf32>
    %cst_22 = arith.constant 5.000000e-01 : f32
    %43 = vector.broadcast %cst_22 : f32 to vector<8x64xf32>
    %44 = arith.mulf %43, %42 : vector<8x64xf32>
    %cst_23 = arith.constant 5.000000e-01 : f32
    %45 = vector.broadcast %cst_23 : f32 to vector<8x64xf32>
    %46 = arith.addf %44, %45 : vector<8x64xf32>
    %47 = arith.mulf %40, %25 : vector<8x64xf32>
    %48 = arith.mulf %35, %41 : vector<8x64xf32>
    %49 = arith.addf %47, %48 : vector<8x64xf32>
    %50 = math.tanh %49 : vector<8x64xf32>
    %51 = arith.mulf %46, %50 : vector<8x64xf32>
    %cst_24 = arith.constant dense<0.000000e+00> : vector<8x256xf32>
    %52 = tpu.matmul %51, %7, %cst_24 {dimension_numbers = #tpu.dot_dimension_numbers<[1], [0], [0], [1], [0, 0, 1, 1], [], []>} : vector<8x64xf32>, vector<64x256xf32>, vector<8x256xf32> -> vector<8x256xf32>
    %c16 = arith.constant 16 : index
    %c0_25 = arith.constant 0 : index
    %53 = vector.load %arg7[%c16, %c0_25] : memref<64x256xf32, #tpu.memory_space<vmem>>, vector<8x256xf32>
    %54 = arith.addf %53, %52 : vector<8x256xf32>
    %55 = math.tanh %54 : vector<8x256xf32>
    %56 = vector.extract_strided_slice %55 {offsets = [0, 0], sizes = [8, 64], strides = [1, 1]} : vector<8x256xf32> to vector<8x64xf32>
    %cst_26 = arith.constant 5.000000e-01 : f32
    %57 = vector.broadcast %cst_26 : f32 to vector<8x64xf32>
    %58 = arith.mulf %57, %56 : vector<8x64xf32>
    %cst_27 = arith.constant 5.000000e-01 : f32
    %59 = vector.broadcast %cst_27 : f32 to vector<8x64xf32>
    %60 = arith.addf %58, %59 : vector<8x64xf32>
    %61 = vector.extract_strided_slice %55 {offsets = [0, 64], sizes = [8, 64], strides = [1, 1]} : vector<8x256xf32> to vector<8x64xf32>
    %cst_28 = arith.constant 5.000000e-01 : f32
    %62 = vector.broadcast %cst_28 : f32 to vector<8x64xf32>
    %63 = arith.mulf %62, %61 : vector<8x64xf32>
    %cst_29 = arith.constant 5.000000e-01 : f32
    %64 = vector.broadcast %cst_29 : f32 to vector<8x64xf32>
    %65 = arith.addf %63, %64 : vector<8x64xf32>
    %66 = vector.extract_strided_slice %55 {offsets = [0, 128], sizes = [8, 64], strides = [1, 1]} : vector<8x256xf32> to vector<8x64xf32>
    %67 = vector.extract_strided_slice %55 {offsets = [0, 192], sizes = [8, 64], strides = [1, 1]} : vector<8x256xf32> to vector<8x64xf32>
    %cst_30 = arith.constant 5.000000e-01 : f32
    %68 = vector.broadcast %cst_30 : f32 to vector<8x64xf32>
    %69 = arith.mulf %68, %67 : vector<8x64xf32>
    %cst_31 = arith.constant 5.000000e-01 : f32
    %70 = vector.broadcast %cst_31 : f32 to vector<8x64xf32>
    %71 = arith.addf %69, %70 : vector<8x64xf32>
    %72 = arith.mulf %65, %49 : vector<8x64xf32>
    %73 = arith.mulf %60, %66 : vector<8x64xf32>
    %74 = arith.addf %72, %73 : vector<8x64xf32>
    %75 = math.tanh %74 : vector<8x64xf32>
    %76 = arith.mulf %71, %75 : vector<8x64xf32>
    %cst_32 = arith.constant dense<0.000000e+00> : vector<8x256xf32>
    %77 = tpu.matmul %76, %7, %cst_32 {dimension_numbers = #tpu.dot_dimension_numbers<[1], [0], [0], [1], [0, 0, 1, 1], [], []>} : vector<8x64xf32>, vector<64x256xf32>, vector<8x256xf32> -> vector<8x256xf32>
    %c24 = arith.constant 24 : index
    %c0_33 = arith.constant 0 : index
    %78 = vector.load %arg7[%c24, %c0_33] : memref<64x256xf32, #tpu.memory_space<vmem>>, vector<8x256xf32>
    %79 = arith.addf %78, %77 : vector<8x256xf32>
    %80 = math.tanh %79 : vector<8x256xf32>
    %81 = vector.extract_strided_slice %80 {offsets = [0, 0], sizes = [8, 64], strides = [1, 1]} : vector<8x256xf32> to vector<8x64xf32>
    %cst_34 = arith.constant 5.000000e-01 : f32
    %82 = vector.broadcast %cst_34 : f32 to vector<8x64xf32>
    %83 = arith.mulf %82, %81 : vector<8x64xf32>
    %cst_35 = arith.constant 5.000000e-01 : f32
    %84 = vector.broadcast %cst_35 : f32 to vector<8x64xf32>
    %85 = arith.addf %83, %84 : vector<8x64xf32>
    %86 = vector.extract_strided_slice %80 {offsets = [0, 64], sizes = [8, 64], strides = [1, 1]} : vector<8x256xf32> to vector<8x64xf32>
    %cst_36 = arith.constant 5.000000e-01 : f32
    %87 = vector.broadcast %cst_36 : f32 to vector<8x64xf32>
    %88 = arith.mulf %87, %86 : vector<8x64xf32>
    %cst_37 = arith.constant 5.000000e-01 : f32
    %89 = vector.broadcast %cst_37 : f32 to vector<8x64xf32>
    %90 = arith.addf %88, %89 : vector<8x64xf32>
    %91 = vector.extract_strided_slice %80 {offsets = [0, 128], sizes = [8, 64], strides = [1, 1]} : vector<8x256xf32> to vector<8x64xf32>
    %92 = vector.extract_strided_slice %80 {offsets = [0, 192], sizes = [8, 64], strides = [1, 1]} : vector<8x256xf32> to vector<8x64xf32>
    %cst_38 = arith.constant 5.000000e-01 : f32
    %93 = vector.broadcast %cst_38 : f32 to vector<8x64xf32>
    %94 = arith.mulf %93, %92 : vector<8x64xf32>
    %cst_39 = arith.constant 5.000000e-01 : f32
    %95 = vector.broadcast %cst_39 : f32 to vector<8x64xf32>
    %96 = arith.addf %94, %95 : vector<8x64xf32>
    %97 = arith.mulf %90, %74 : vector<8x64xf32>
    %98 = arith.mulf %85, %91 : vector<8x64xf32>
    %99 = arith.addf %97, %98 : vector<8x64xf32>
    %100 = math.tanh %99 : vector<8x64xf32>
    %101 = arith.mulf %96, %100 : vector<8x64xf32>
    %cst_40 = arith.constant dense<0.000000e+00> : vector<8x256xf32>
    %102 = tpu.matmul %101, %7, %cst_40 {dimension_numbers = #tpu.dot_dimension_numbers<[1], [0], [0], [1], [0, 0, 1, 1], [], []>} : vector<8x64xf32>, vector<64x256xf32>, vector<8x256xf32> -> vector<8x256xf32>
    %c32 = arith.constant 32 : index
    %c0_41 = arith.constant 0 : index
    %103 = vector.load %arg7[%c32, %c0_41] : memref<64x256xf32, #tpu.memory_space<vmem>>, vector<8x256xf32>
    %104 = arith.addf %103, %102 : vector<8x256xf32>
    %105 = math.tanh %104 : vector<8x256xf32>
    %106 = vector.extract_strided_slice %105 {offsets = [0, 0], sizes = [8, 64], strides = [1, 1]} : vector<8x256xf32> to vector<8x64xf32>
    %cst_42 = arith.constant 5.000000e-01 : f32
    %107 = vector.broadcast %cst_42 : f32 to vector<8x64xf32>
    %108 = arith.mulf %107, %106 : vector<8x64xf32>
    %cst_43 = arith.constant 5.000000e-01 : f32
    %109 = vector.broadcast %cst_43 : f32 to vector<8x64xf32>
    %110 = arith.addf %108, %109 : vector<8x64xf32>
    %111 = vector.extract_strided_slice %105 {offsets = [0, 64], sizes = [8, 64], strides = [1, 1]} : vector<8x256xf32> to vector<8x64xf32>
    %cst_44 = arith.constant 5.000000e-01 : f32
    %112 = vector.broadcast %cst_44 : f32 to vector<8x64xf32>
    %113 = arith.mulf %112, %111 : vector<8x64xf32>
    %cst_45 = arith.constant 5.000000e-01 : f32
    %114 = vector.broadcast %cst_45 : f32 to vector<8x64xf32>
    %115 = arith.addf %113, %114 : vector<8x64xf32>
    %116 = vector.extract_strided_slice %105 {offsets = [0, 128], sizes = [8, 64], strides = [1, 1]} : vector<8x256xf32> to vector<8x64xf32>
    %117 = vector.extract_strided_slice %105 {offsets = [0, 192], sizes = [8, 64], strides = [1, 1]} : vector<8x256xf32> to vector<8x64xf32>
    %cst_46 = arith.constant 5.000000e-01 : f32
    %118 = vector.broadcast %cst_46 : f32 to vector<8x64xf32>
    %119 = arith.mulf %118, %117 : vector<8x64xf32>
    %cst_47 = arith.constant 5.000000e-01 : f32
    %120 = vector.broadcast %cst_47 : f32 to vector<8x64xf32>
    %121 = arith.addf %119, %120 : vector<8x64xf32>
    %122 = arith.mulf %115, %99 : vector<8x64xf32>
    %123 = arith.mulf %110, %116 : vector<8x64xf32>
    %124 = arith.addf %122, %123 : vector<8x64xf32>
    %125 = math.tanh %124 : vector<8x64xf32>
    %126 = arith.mulf %121, %125 : vector<8x64xf32>
    %cst_48 = arith.constant dense<0.000000e+00> : vector<8x256xf32>
    %127 = tpu.matmul %126, %7, %cst_48 {dimension_numbers = #tpu.dot_dimension_numbers<[1], [0], [0], [1], [0, 0, 1, 1], [], []>} : vector<8x64xf32>, vector<64x256xf32>, vector<8x256xf32> -> vector<8x256xf32>
    %c40 = arith.constant 40 : index
    %c0_49 = arith.constant 0 : index
    %128 = vector.load %arg7[%c40, %c0_49] : memref<64x256xf32, #tpu.memory_space<vmem>>, vector<8x256xf32>
    %129 = arith.addf %128, %127 : vector<8x256xf32>
    %130 = math.tanh %129 : vector<8x256xf32>
    %131 = vector.extract_strided_slice %130 {offsets = [0, 0], sizes = [8, 64], strides = [1, 1]} : vector<8x256xf32> to vector<8x64xf32>
    %cst_50 = arith.constant 5.000000e-01 : f32
    %132 = vector.broadcast %cst_50 : f32 to vector<8x64xf32>
    %133 = arith.mulf %132, %131 : vector<8x64xf32>
    %cst_51 = arith.constant 5.000000e-01 : f32
    %134 = vector.broadcast %cst_51 : f32 to vector<8x64xf32>
    %135 = arith.addf %133, %134 : vector<8x64xf32>
    %136 = vector.extract_strided_slice %130 {offsets = [0, 64], sizes = [8, 64], strides = [1, 1]} : vector<8x256xf32> to vector<8x64xf32>
    %cst_52 = arith.constant 5.000000e-01 : f32
    %137 = vector.broadcast %cst_52 : f32 to vector<8x64xf32>
    %138 = arith.mulf %137, %136 : vector<8x64xf32>
    %cst_53 = arith.constant 5.000000e-01 : f32
    %139 = vector.broadcast %cst_53 : f32 to vector<8x64xf32>
    %140 = arith.addf %138, %139 : vector<8x64xf32>
    %141 = vector.extract_strided_slice %130 {offsets = [0, 128], sizes = [8, 64], strides = [1, 1]} : vector<8x256xf32> to vector<8x64xf32>
    %142 = vector.extract_strided_slice %130 {offsets = [0, 192], sizes = [8, 64], strides = [1, 1]} : vector<8x256xf32> to vector<8x64xf32>
    %cst_54 = arith.constant 5.000000e-01 : f32
    %143 = vector.broadcast %cst_54 : f32 to vector<8x64xf32>
    %144 = arith.mulf %143, %142 : vector<8x64xf32>
    %cst_55 = arith.constant 5.000000e-01 : f32
    %145 = vector.broadcast %cst_55 : f32 to vector<8x64xf32>
    %146 = arith.addf %144, %145 : vector<8x64xf32>
    %147 = arith.mulf %140, %124 : vector<8x64xf32>
    %148 = arith.mulf %135, %141 : vector<8x64xf32>
    %149 = arith.addf %147, %148 : vector<8x64xf32>
    %150 = math.tanh %149 : vector<8x64xf32>
    %151 = arith.mulf %146, %150 : vector<8x64xf32>
    %cst_56 = arith.constant dense<0.000000e+00> : vector<8x256xf32>
    %152 = tpu.matmul %151, %7, %cst_56 {dimension_numbers = #tpu.dot_dimension_numbers<[1], [0], [0], [1], [0, 0, 1, 1], [], []>} : vector<8x64xf32>, vector<64x256xf32>, vector<8x256xf32> -> vector<8x256xf32>
    %c48 = arith.constant 48 : index
    %c0_57 = arith.constant 0 : index
    %153 = vector.load %arg7[%c48, %c0_57] : memref<64x256xf32, #tpu.memory_space<vmem>>, vector<8x256xf32>
    %154 = arith.addf %153, %152 : vector<8x256xf32>
    %155 = math.tanh %154 : vector<8x256xf32>
    %156 = vector.extract_strided_slice %155 {offsets = [0, 0], sizes = [8, 64], strides = [1, 1]} : vector<8x256xf32> to vector<8x64xf32>
    %cst_58 = arith.constant 5.000000e-01 : f32
    %157 = vector.broadcast %cst_58 : f32 to vector<8x64xf32>
    %158 = arith.mulf %157, %156 : vector<8x64xf32>
    %cst_59 = arith.constant 5.000000e-01 : f32
    %159 = vector.broadcast %cst_59 : f32 to vector<8x64xf32>
    %160 = arith.addf %158, %159 : vector<8x64xf32>
    %161 = vector.extract_strided_slice %155 {offsets = [0, 64], sizes = [8, 64], strides = [1, 1]} : vector<8x256xf32> to vector<8x64xf32>
    %cst_60 = arith.constant 5.000000e-01 : f32
    %162 = vector.broadcast %cst_60 : f32 to vector<8x64xf32>
    %163 = arith.mulf %162, %161 : vector<8x64xf32>
    %cst_61 = arith.constant 5.000000e-01 : f32
    %164 = vector.broadcast %cst_61 : f32 to vector<8x64xf32>
    %165 = arith.addf %163, %164 : vector<8x64xf32>
    %166 = vector.extract_strided_slice %155 {offsets = [0, 128], sizes = [8, 64], strides = [1, 1]} : vector<8x256xf32> to vector<8x64xf32>
    %167 = vector.extract_strided_slice %155 {offsets = [0, 192], sizes = [8, 64], strides = [1, 1]} : vector<8x256xf32> to vector<8x64xf32>
    %cst_62 = arith.constant 5.000000e-01 : f32
    %168 = vector.broadcast %cst_62 : f32 to vector<8x64xf32>
    %169 = arith.mulf %168, %167 : vector<8x64xf32>
    %cst_63 = arith.constant 5.000000e-01 : f32
    %170 = vector.broadcast %cst_63 : f32 to vector<8x64xf32>
    %171 = arith.addf %169, %170 : vector<8x64xf32>
    %172 = arith.mulf %165, %149 : vector<8x64xf32>
    %173 = arith.mulf %160, %166 : vector<8x64xf32>
    %174 = arith.addf %172, %173 : vector<8x64xf32>
    %175 = math.tanh %174 : vector<8x64xf32>
    %176 = arith.mulf %171, %175 : vector<8x64xf32>
    %cst_64 = arith.constant dense<0.000000e+00> : vector<8x256xf32>
    %177 = tpu.matmul %176, %7, %cst_64 {dimension_numbers = #tpu.dot_dimension_numbers<[1], [0], [0], [1], [0, 0, 1, 1], [], []>} : vector<8x64xf32>, vector<64x256xf32>, vector<8x256xf32> -> vector<8x256xf32>
    %c56 = arith.constant 56 : index
    %c0_65 = arith.constant 0 : index
    %178 = vector.load %arg7[%c56, %c0_65] : memref<64x256xf32, #tpu.memory_space<vmem>>, vector<8x256xf32>
    %179 = arith.addf %178, %177 : vector<8x256xf32>
    %180 = math.tanh %179 : vector<8x256xf32>
    %181 = vector.extract_strided_slice %180 {offsets = [0, 0], sizes = [8, 64], strides = [1, 1]} : vector<8x256xf32> to vector<8x64xf32>
    %cst_66 = arith.constant 5.000000e-01 : f32
    %182 = vector.broadcast %cst_66 : f32 to vector<8x64xf32>
    %183 = arith.mulf %182, %181 : vector<8x64xf32>
    %cst_67 = arith.constant 5.000000e-01 : f32
    %184 = vector.broadcast %cst_67 : f32 to vector<8x64xf32>
    %185 = arith.addf %183, %184 : vector<8x64xf32>
    %186 = vector.extract_strided_slice %180 {offsets = [0, 64], sizes = [8, 64], strides = [1, 1]} : vector<8x256xf32> to vector<8x64xf32>
    %cst_68 = arith.constant 5.000000e-01 : f32
    %187 = vector.broadcast %cst_68 : f32 to vector<8x64xf32>
    %188 = arith.mulf %187, %186 : vector<8x64xf32>
    %cst_69 = arith.constant 5.000000e-01 : f32
    %189 = vector.broadcast %cst_69 : f32 to vector<8x64xf32>
    %190 = arith.addf %188, %189 : vector<8x64xf32>
    %191 = vector.extract_strided_slice %180 {offsets = [0, 128], sizes = [8, 64], strides = [1, 1]} : vector<8x256xf32> to vector<8x64xf32>
    %192 = vector.extract_strided_slice %180 {offsets = [0, 192], sizes = [8, 64], strides = [1, 1]} : vector<8x256xf32> to vector<8x64xf32>
    %cst_70 = arith.constant 5.000000e-01 : f32
    %193 = vector.broadcast %cst_70 : f32 to vector<8x64xf32>
    %194 = arith.mulf %193, %192 : vector<8x64xf32>
    %cst_71 = arith.constant 5.000000e-01 : f32
    %195 = vector.broadcast %cst_71 : f32 to vector<8x64xf32>
    %196 = arith.addf %194, %195 : vector<8x64xf32>
    %197 = arith.mulf %190, %174 : vector<8x64xf32>
    %198 = arith.mulf %185, %191 : vector<8x64xf32>
    %199 = arith.addf %197, %198 : vector<8x64xf32>
    %200 = math.tanh %199 : vector<8x64xf32>
    %201 = arith.mulf %196, %200 : vector<8x64xf32>
    %cst_72 = arith.constant dense<0.000000e+00> : vector<8x256xf32>
    %202 = tpu.matmul %201, %7, %cst_72 {dimension_numbers = #tpu.dot_dimension_numbers<[1], [0], [0], [1], [0, 0, 1, 1], [], []>} : vector<8x64xf32>, vector<64x256xf32>, vector<8x256xf32> -> vector<8x256xf32>
    %c0_73 = arith.constant 0 : index
    %c0_74 = arith.constant 0 : index
    %203 = vector.load %arg2[%c0_73, %c0_74] : memref<1x256xf32, #tpu.memory_space<vmem>>, vector<1x256xf32>
    %204 = vector.broadcast %203 : vector<1x256xf32> to vector<8x256xf32>
    %205 = arith.addf %202, %204 : vector<8x256xf32>
    %206 = math.tanh %205 : vector<8x256xf32>
    %207 = vector.extract_strided_slice %206 {offsets = [0, 32], sizes = [8, 32], strides = [1, 1]} : vector<8x256xf32> to vector<8x32xf32>
    %cst_75 = arith.constant 5.000000e-01 : f32
    %208 = vector.broadcast %cst_75 : f32 to vector<8x32xf32>
    %209 = arith.mulf %208, %207 : vector<8x32xf32>
    %cst_76 = arith.constant 5.000000e-01 : f32
    %210 = vector.broadcast %cst_76 : f32 to vector<8x32xf32>
    %211 = arith.addf %209, %210 : vector<8x32xf32>
    %212 = vector.extract_strided_slice %206 {offsets = [0, 96], sizes = [8, 32], strides = [1, 1]} : vector<8x256xf32> to vector<8x32xf32>
    %cst_77 = arith.constant 5.000000e-01 : f32
    %213 = vector.broadcast %cst_77 : f32 to vector<8x32xf32>
    %214 = arith.mulf %213, %212 : vector<8x32xf32>
    %cst_78 = arith.constant 5.000000e-01 : f32
    %215 = vector.broadcast %cst_78 : f32 to vector<8x32xf32>
    %216 = arith.addf %214, %215 : vector<8x32xf32>
    %217 = vector.extract_strided_slice %206 {offsets = [0, 160], sizes = [8, 32], strides = [1, 1]} : vector<8x256xf32> to vector<8x32xf32>
    %218 = vector.extract_strided_slice %206 {offsets = [0, 224], sizes = [8, 32], strides = [1, 1]} : vector<8x256xf32> to vector<8x32xf32>
    %cst_79 = arith.constant 5.000000e-01 : f32
    %219 = vector.broadcast %cst_79 : f32 to vector<8x32xf32>
    %220 = arith.mulf %219, %218 : vector<8x32xf32>
    %cst_80 = arith.constant 5.000000e-01 : f32
    %221 = vector.broadcast %cst_80 : f32 to vector<8x32xf32>
    %222 = arith.addf %220, %221 : vector<8x32xf32>
    %223 = vector.extract_strided_slice %199 {offsets = [0, 32], sizes = [8, 32], strides = [1, 1]} : vector<8x64xf32> to vector<8x32xf32>
    %224 = arith.mulf %216, %223 : vector<8x32xf32>
    %225 = arith.mulf %211, %217 : vector<8x32xf32>
    %226 = arith.addf %224, %225 : vector<8x32xf32>
    %227 = math.tanh %226 : vector<8x32xf32>
    %228 = arith.mulf %222, %227 : vector<8x32xf32>
    %c0_81 = arith.constant 0 : index
    %c0_82 = arith.constant 0 : index
    %229 = vector.load %arg4[%c0_81, %c0_82] : memref<1x32xf32, #tpu.memory_space<vmem>>, vector<1x32xf32>
    %230 = vector.broadcast %229 : vector<1x32xf32> to vector<8x32xf32>
    %231 = arith.mulf %228, %230 : vector<8x32xf32>
    %cst_83 = arith.constant dense<0.000000e+00> : vector<8xf32>
    %232 = vector.multi_reduction <add>, %231, %cst_83 [1] : vector<8x32xf32> to vector<8xf32>
    %233 = vector.shape_cast %232 : vector<8xf32> to vector<8x1xf32>
    %c0_84 = arith.constant 0 : index
    %c0_85 = arith.constant 0 : index
    %234 = vector.load %arg5[%c0_84, %c0_85] : memref<1x1xf32, #tpu.memory_space<vmem>>, vector<1x1xf32>
    %235 = vector.broadcast %234 : vector<1x1xf32> to vector<8x1xf32>
    %236 = arith.addf %233, %235 : vector<8x1xf32>
    %c0_86 = arith.constant 0 : index
    %c0_87 = arith.constant 0 : index
    %237 = vector.load %arg6[%c0_86, %c0_87] : memref<8x1xf32, #tpu.memory_space<vmem>>, vector<8x1xf32>
    tpu.vector_store %arg6[%c0_86, %c0_87], %236 {strides = array<i32>} : memref<8x1xf32, #tpu.memory_space<vmem>>, vector<8x1xf32>,
    return
  }
}

</mosaic_0001>

<bundles_post_ra>
// kernel: tpu_custom_call.1
= control target key start
LH: loop header
LB: loop body
LE: loop exit
PB: predicated region body
PF: predicated region fallthrough
CT: control target
= control target key end

     0   :  { %s1282_s0 = inlined_call_operand.hbm [shape: f32[64,64], index: 0, kind: input, shape index: {}]   ;;  %s1283_s1 = inlined_call_operand.hbm [shape: f32[64,256], index: 1, kind: input, shape index: {}]   ;;  %s1284_s2 = inlined_call_operand.vmem [shape: f32[1,256], index: 2, kind: input, shape index: {}]   ;;  %s1285_s3 = inlined_call_operand.hbm [shape: f32[64,256], index: 3, kind: input, shape index: {}]   ;;  %s1286_s4 = inlined_call_operand.vmem [shape: f32[1,32], index: 4, kind: input, shape index: {}]   ;;  %s1287_s5 = inlined_call_operand.<no memory space> [shape: f32[1,1], index: 5, kind: input, shape index: {}]   ;;  %s1288_s6 = inlined_call_operand.vmem [shape: f32[8,1], index: 6, kind: output, shape index: {}]  }
   0x1   :  { %v11_v0 = vstv %s1287_s5 }
   0x2   :  { %12 = vst [vmem:[#allocation3] sm:$0x1] %v11_v0 }
   0x3   :  { %13 = vsyncpa [#allocation5], 0 }
   0x4   :  { %14 = vsyncpa [#allocation7], 0  ;;  %s32_s25 = sshll.u32 %s1283_s1, 4  ;;  %s980_s26 = smov [#allocation6]   ;;  %s33_s25 = int_to_ptr.hbm [resolvable:$true] %s32_s25 }
   0x5   :  { %s34_s27 = sshll.u32 %s980_s26, 4  ;;  %s19_s30 = sshll.u32 %s1282_s0, 4  ;;  %s35_s27 = int_to_ptr.vmem [resolvable:$true] %s34_s27  ;;  %s20_s30 = int_to_ptr.hbm [resolvable:$true] %s19_s30 }
   0x6   :  { %s981_s7 = smov 256   ;;  %s982_s8 = smov 16  }
   0x7   :  { %40 = dma.hbm_to_vmem [thread:$0]  %s33_s25, 2048, %s35_s27, [#allocation7], %s981_s7, %s981_s7, %s982_s8  }
   0x8   :  { %s983_s5 = smov [#allocation4]   ;;  %s984_s10 = smov 128  }
   0x9   :  { %s21_s9 = sshll.u32 %s983_s5, 4  ;;  %s985_s11 = smov 8   ;;  %s22_s9 = int_to_ptr.vmem [resolvable:$true] %s21_s9 }
   0xa   :  { %27 = dma.hbm_to_vmem [thread:$0]  %s20_s30, 1024, %s22_s9, [#allocation5], %s984_s10, %s984_s10, %s985_s11  }
   0xb   :  { %s47_s13 = sshll.u32 %s1285_s3, 4  ;;  %s986_s14 = smov [#allocation8]   ;;  %s48_s13 = int_to_ptr.hbm [resolvable:$true] %s47_s13 }
   0xc   :  { %s49_s15 = sshll.u32 %s986_s14, 4  ;;  %s50_s15 = int_to_ptr.vmem [resolvable:$true] %s49_s15 }
   0xd   :  { %55 = dma.hbm_to_vmem [thread:$0]  %s48_s13, 2048, %s50_s15, [#allocation7], %s981_s7, %s981_s7, %s982_s8  }
   0xe   :  { %976 = dma.done.wait [#allocation5], 1024  }
   0xf   :  { %977 = vsyncadd [#allocation5], 4294966272 }
  0x10   :  { %978 = dma.done.wait [#allocation7], 4096  }
  0x11   :  { %979 = vsyncadd [#allocation7], 4294963200  ;;  %v94_v1 = vld [vmem:[#allocation6 + $0x70] sm:$0xff]  ;;  %v92_v2 = vld [vmem:[#allocation6 + $0x60] sm:$0xff]  ;;  %vm102_vm0 = vcmask 523264   ;;  %vm256_vm1 = vcmask 261120  }
  0x12   :  { %135 = vmatpush.msra.mxu0 %v94_v1  ;;  %v95_v3 = vld [vmem:[#allocation6 + $0x78] sm:$0xff]  ;;  %v93_v4 = vld [vmem:[#allocation6 + $0x68] sm:$0xff]  ;;  %v90_v5 = vld [vmem:[#allocation6 + $0x50] sm:$0xff]  ;;  %s987_s16 = smov 64   ;;  %s988_s19 = smov 96   ;;  %vm798_vm2 = vcmask 7168  }
  0x13   :  { %176 = vmatpush.msra.mxu1 %v95_v3  ;;  %v91_v6 = vld [vmem:[#allocation6 + $0x58] sm:$0xff]  ;;  %v88_v7 = vld [vmem:[#allocation6 + $0x40] sm:$0xff]  ;;  %v89_v8 = vld [vmem:[#allocation6 + $0x48] sm:$0xff] }
  0x14   :  { %136 = vmatpush.msra.mxu0 %v92_v2  ;;  %v86_v9 = vld [vmem:[#allocation6 + $0x30] sm:$0xff]  ;;  %v87_v10 = vld [vmem:[#allocation6 + $0x38] sm:$0xff]  ;;  %v84_v11 = vld [vmem:[#allocation6 + $0x20] sm:$0xff] }
  0x15   :  { %177 = vmatpush.msra.mxu1 %v93_v4  ;;  %v85_v12 = vld [vmem:[#allocation6 + $0x28] sm:$0xff]  ;;  %v82_v13 = vld [vmem:[#allocation6 + $0x10] sm:$0xff]  ;;  %v83_v14 = vld [vmem:[#allocation6 + $0x18] sm:$0xff] }
  0x16   :  { %137 = vmatpush.msra.mxu0 %v90_v5  ;;  %v80_v15 = vld [vmem:[#allocation6] sm:$0xff]  ;;  %v81_v17 = vld [vmem:[#allocation6 + $0x8] sm:$0xff]  ;;  %v1051_v32 = vld [vmem:[#allocation8 + $0x70] sm:$0xff] }
  0x17   :  { %178 = vmatpush.msra.mxu1 %v91_v6  ;;  %v72_v16 = vld [vmem:[#allocation4] sm:$0xff]  ;;  %v1053_v33 = vld [vmem:[#allocation8 + $0x78] sm:$0xff]  ;;  %274 = vmatpush.msra.mxu2 %v1051_v32  ;;  %v1059_v35 = vld [vmem:[#allocation8 + $0x68] sm:$0xff] }
  0x18   :  { %138 = vmatpush.msra.mxu0 %v88_v7  ;;  %v96_v18 = vld [vmem:[%s1284_s2] sm:$0x3]  ;;  %294 = vmatpush.msra.mxu3 %v1053_v33  ;;  %v1061_v36 = vld [vmem:[#allocation8 + $0x50] sm:$0xff]  ;;  %v1071_v39 = vld [vmem:[#allocation8 + $0x48] sm:$0xff] }
  0x19   :  { %179 = vmatpush.msra.mxu1 %v89_v8  ;;  %v1042_v19 = vperm.slane %v96_v18, 0  ;;  %v1044_v20 = vperm.slane %v96_v18, 1  ;;  %v1055_v34 = vld [vmem:[#allocation8 + $0x60] sm:$0xff]  ;;  %v1063_v37 = vld [vmem:[#allocation8 + $0x58] sm:$0xff]  ;;  %v1077_v40 = vld [vmem:[#allocation8 + $0x30] sm:$0xff] }
  0x1a   :  { %139 = vmatpush.msra.mxu0 %v86_v9  ;;  %275 = vmatpush.msra.mxu2 %v1055_v34  ;;  %v1069_v38 = vld [vmem:[#allocation8 + $0x40] sm:$0xff]  ;;  %v1079_v41 = vld [vmem:[#allocation8 + $0x38] sm:$0xff]  ;;  %v1087_v43 = vld [vmem:[#allocation8 + $0x28] sm:$0xff] }
  0x1b   :  { %180 = vmatpush.msra.mxu1 %v87_v10  ;;  %295 = vmatpush.msra.mxu3 %v1059_v35  ;;  %v1085_v42 = vld [vmem:[#allocation8 + $0x20] sm:$0xff]  ;;  %v1093_v44 = vld [vmem:[#allocation8 + $0x10] sm:$0xff]  ;;  %v1095_v45 = vld [vmem:[#allocation8 + $0x18] sm:$0xff] }
  0x1c   :  { %140 = vmatpush.msra.mxu0 %v84_v11  ;;  %276 = vmatpush.msra.mxu2 %v1061_v36  ;;  %v1108_v50 = vld [vmem:[#allocation8] sm:$0xff]  ;;  %v1110_v51 = vld [vmem:[#allocation8 + $0x8] sm:$0xff] }
  0x1d   :  { %181 = vmatpush.msra.mxu1 %v85_v12  ;;  %296 = vmatpush.msra.mxu3 %v1063_v37  ;;  %v73_v52 = vld [vmem:[#allocation4 + $0x8] sm:$0xff]  ;;  %v74_v12 = vld [vmem:[#allocation4 + $0x10] sm:$0xff] }
  0x1e   :  { %141 = vmatpush.msra.mxu0 %v82_v13  ;;  %277 = vmatpush.msra.mxu2 %v1069_v38 }
  0x1f   :  { %182 = vmatpush.msra.mxu1 %v83_v14  ;;  %297 = vmatpush.msra.mxu3 %v1071_v39 }
  0x20   :  { %142 = vmatpush.msra.mxu0 %v80_v15  ;;  %278 = vmatpush.msra.mxu2 %v1077_v40 }
  0x21   :  { %806 = vmatmul.msk.f32.vlgmr.msra.gmra.mxu0 %vm102_vm0, %v72_v16  ;;  %183 = vmatpush.msra.mxu1 %v81_v17 }
  0x22   :  { %814 = vmatmul.msk.f32.vlgmr.msra.gmra.mxu1 %vm102_vm0, %v72_v16  ;;  %534 = vmatpush.msrb.mxu0 %v1051_v32 }
  0x23   :  { %554 = vmatpush.msrb.mxu1 %v1053_v33  ;;  %298 = vmatpush.msra.mxu3 %v1079_v41 }
  0x24   :  { %535 = vmatpush.msrb.mxu0 %v1055_v34  ;;  %279 = vmatpush.msra.mxu2 %v1085_v42 }
  0x25   :  { %555 = vmatpush.msrb.mxu1 %v1059_v35  ;;  %299 = vmatpush.msra.mxu3 %v1087_v43 }
  0x26   :  { %536 = vmatpush.msrb.mxu0 %v1061_v36  ;;  %280 = vmatpush.msra.mxu2 %v1093_v44 }
  0x27   :  { %556 = vmatpush.msrb.mxu1 %v1063_v37  ;;  %300 = vmatpush.msra.mxu3 %v1095_v45 }
  0x28   :  { %537 = vmatpush.msrb.mxu0 %v1069_v38  ;;  %281 = vmatpush.msra.mxu2 %v1108_v50 }
  0x29   :  { %557 = vmatpush.msrb.mxu1 %v1071_v39  ;;  %301 = vmatpush.msra.mxu3 %v1110_v51 }
  0x2a   :  { %538 = vmatpush.msrb.mxu0 %v1077_v40  ;;  %342 = vmatpush.msrb.mxu2 %v1051_v32 }
  0x2b   :  { %558 = vmatpush.msrb.mxu1 %v1079_v41  ;;  %362 = vmatpush.msrb.mxu3 %v1053_v33 }
  0x2c   :  { %539 = vmatpush.msrb.mxu0 %v1085_v42  ;;  %815 = vmatmul.msk.f32.gmra.mxu1 %vm102_vm0, %v73_v52 }
  0x2d   :  { %559 = vmatpush.msrb.mxu1 %v1087_v43  ;;  %807 = vmatmul.msk.f32.gmra.mxu0 %vm102_vm0, %v73_v52  ;;  %v75_v52 = vld [vmem:[#allocation4 + $0x18] sm:$0xff] }
  0x2e   :  { %540 = vmatpush.msrb.mxu0 %v1093_v44  ;;  %343 = vmatpush.msrb.mxu2 %v1055_v34 }
  0x2f   :  { %560 = vmatpush.msrb.mxu1 %v1095_v45  ;;  %363 = vmatpush.msrb.mxu3 %v1059_v35 }
  0x30   :  { %541 = vmatpush.msrb.mxu0 %v1108_v50  ;;  %344 = vmatpush.msrb.mxu2 %v1061_v36 }
  0x31   :  { %561 = vmatpush.msrb.mxu1 %v1110_v51  ;;  %364 = vmatpush.msrb.mxu3 %v1063_v37 }
  0x32   :  { %662 = vmatpush.msra.mxu0 %v1051_v32  ;;  %345 = vmatpush.msrb.mxu2 %v1069_v38 }
  0x33   :  { %682 = vmatpush.msra.mxu1 %v1053_v33  ;;  %365 = vmatpush.msrb.mxu3 %v1071_v39 }
  0x34   :  { %663 = vmatpush.msra.mxu0 %v1055_v34  ;;  %346 = vmatpush.msrb.mxu2 %v1077_v40 }
  0x35   :  { %683 = vmatpush.msra.mxu1 %v1059_v35  ;;  %366 = vmatpush.msrb.mxu3 %v1079_v41 }
  0x36   :  { %664 = vmatpush.msra.mxu0 %v1061_v36  ;;  %347 = vmatpush.msrb.mxu2 %v1085_v42 }
  0x37   :  { %684 = vmatpush.msra.mxu1 %v1063_v37  ;;  %367 = vmatpush.msrb.mxu3 %v1087_v43 }
  0x38   :  { %665 = vmatpush.msra.mxu0 %v1069_v38  ;;  %348 = vmatpush.msrb.mxu2 %v1093_v44 }
  0x39   :  { %685 = vmatpush.msra.mxu1 %v1071_v39  ;;  %368 = vmatpush.msrb.mxu3 %v1095_v45 }
  0x3a   :  { %666 = vmatpush.msra.mxu0 %v1077_v40  ;;  %349 = vmatpush.msrb.mxu2 %v1108_v50 }
  0x3b   :  { %686 = vmatpush.msra.mxu1 %v1079_v41  ;;  %369 = vmatpush.msrb.mxu3 %v1110_v51 }
  0x3c   :  { %667 = vmatpush.msra.mxu0 %v1085_v42  ;;  %816 = vmatmul.msk.f32.gmra.mxu1 %vm102_vm0, %v74_v12 }
  0x3d   :  { %687 = vmatpush.msra.mxu1 %v1087_v43  ;;  %808 = vmatmul.msk.f32.gmra.mxu0 %vm102_vm0, %v74_v12 }
  0x3e   :  { %668 = vmatpush.msra.mxu0 %v1093_v44 }
  0x3f   :  { %688 = vmatpush.msra.mxu1 %v1095_v45 }
  0x40   :  { %669 = vmatpush.msra.mxu0 %v1108_v50 }
  0x41   :  { %689 = vmatpush.msra.mxu1 %v1110_v51 }
  0x44   :  { %817 = vmatmul.msk.f32.gmra.mxu1 %vm102_vm0, %v75_v52 }
  0x45   :  { %809 = vmatmul.msk.f32.gmra.mxu0 %vm102_vm0, %v75_v52 }
  0x9e   :  { %v144_v21 = vpop.f32.mrf.mxu0 }
  0x9f   :  { %v145_v22 = vadd.f32 %v144_v21, %v1042_v19  ;;  %v185_v23 = vpop.f32.mrf.mxu1 }
  0xa0   :  { %v186_v24 = vadd.f32 %v185_v23, %v1044_v20 }
  0xa1   :  { %850 = vtanh.f32 %v145_v22 }
  0xa2   :  { %852 = vtanh.f32 %v186_v24 }
  0xa7   :  { %v851_v25 = vpop.eup %850 }
  0xa8   :  { %v245_v26 = vmul.f32 0.5, %v851_v25  ;;  %v853_v27 = vpop.eup %852 }
  0xa9   :  { %v247_v46 = vmul.f32 0.5, %v853_v27  ;;  %v188_v56 = vpop.f32.mrf.mxu1 }
  0xaa   :  { %v246_v28 = vadd.f32 0.5, %v245_v26  ;;  %v147_v55 = vpop.f32.mrf.mxu0  ;;  %v189_v58 = vadd.f32 %v188_v56, %v1044_v20 }
  0xab   :  { %v248_v47 = vadd.f32 0.5, %v247_v46  ;;  %v148_v57 = vadd.f32 %v147_v55, %v1042_v19 }
  0xac   :  { %v249_v29 = vmul.f32 %v853_v27, %v246_v28 }
  0xae   :  { %v257_v30 = vsel %vm256_vm1, %v249_v29, 0.0  ;;  %854 = vtanh.f32 %v249_v29 }
  0xaf   :  { %317 = vrot.lane.b32.xlu1 %v257_v30, %s987_s16 }
  0xb4   :  { %v855_v31 = vpop.eup %854 }
  0xb5   :  { %252 = vrot.lane.b32.xlu0 %v855_v31, %s987_s16 }
  0xb9   :  { %v191_v15 = vpop.f32.mrf.mxu1 }
  0xba   :  { %v150_v14 = vpop.f32.mrf.mxu0  ;;  %v192_v17 = vadd.f32 %v191_v15, %v1044_v20 }
  0xbb   :  { %v151_v16 = vadd.f32 %v150_v14, %v1042_v19 }
  0xc1   :  { %v194_v55 = vpop.f32.mrf.mxu1 }
 0x121   :  { %v318_v4 = vpop.permute.xlu1 %317 }
 0x127   :  { %v253_v48 = vpop.permute.xlu0 %252 }
 0x128   :  { %v255_v49 = vmul.f32 %v253_v48, %v248_v47 }
 0x12a   :  { %259 = vrot.lane.b32.xlu0 %v255_v49, %s987_s16 }
 0x19c   :  { %v260_v53 = vpop.permute.xlu0 %259 }
 0x19d   :  { %v262_v54 = vsel %vm256_vm1, %v260_v53, 0.0 }
 0x19e   :  { %822 = vmatmul.msk.f32.vlgmr.msra.gmra.mxu2 %vm102_vm0, %v262_v54  ;;  %823 = vmatmul.msk.f32.vlgmr.msra.gmra.mxu3 %vm102_vm0, %v262_v54  ;;  %v153_v54 = vpop.f32.mrf.mxu0 }
 0x19f   :  { %406 = vmatpush.msra.mxu2 %v1051_v32  ;;  %426 = vmatpush.msra.mxu3 %v1053_v33  ;;  %v154_v56 = vadd.f32 %v153_v54, %v1042_v19 }
 0x1a1   :  { %407 = vmatpush.msra.mxu2 %v1055_v34  ;;  %427 = vmatpush.msra.mxu3 %v1059_v35 }
 0x1a3   :  { %408 = vmatpush.msra.mxu2 %v1061_v36  ;;  %428 = vmatpush.msra.mxu3 %v1063_v37 }
 0x1a5   :  { %409 = vmatpush.msra.mxu2 %v1069_v38  ;;  %429 = vmatpush.msra.mxu3 %v1071_v39 }
 0x1a7   :  { %410 = vmatpush.msra.mxu2 %v1077_v40  ;;  %430 = vmatpush.msra.mxu3 %v1079_v41 }
 0x1a9   :  { %411 = vmatpush.msra.mxu2 %v1085_v42  ;;  %431 = vmatpush.msra.mxu3 %v1087_v43 }
 0x1ab   :  { %412 = vmatpush.msra.mxu2 %v1093_v44  ;;  %432 = vmatpush.msra.mxu3 %v1095_v45 }
 0x1ad   :  { %413 = vmatpush.msra.mxu2 %v1108_v50  ;;  %433 = vmatpush.msra.mxu3 %v1110_v51 }
 0x221   :  { %v283_v59 = vpop.f32.mrf.mxu2  ;;  %v303_v60 = vpop.f32.mrf.mxu3 }
 0x222   :  { %v308_v61 = vadd.f32 %v283_v59, %v148_v57  ;;  %v309_v62 = vadd.f32 %v303_v60, %v189_v58  ;;  %v195_v57 = vadd.f32 %v194_v55, %v1044_v20 }
 0x224   :  { %856 = vtanh.f32 %v308_v61 }
 0x225   :  { %858 = vtanh.f32 %v309_v62 }
 0x22a   :  { %v857_v63 = vpop.eup %856 }
 0x22b   :  { %v312_v0 = vmul.f32 0.5, %v857_v63  ;;  %v859_v2 = vpop.eup %858 }
 0x22c   :  { %v314_v8 = vmul.f32 0.5, %v859_v2 }
 0x22d   :  { %v313_v1 = vadd.f32 0.5, %v312_v0 }
 0x22e   :  { %v315_v9 = vadd.f32 0.5, %v314_v8 }
 0x22f   :  { %v321_v3 = vmul.f32 %v859_v2, %v313_v1  ;;  %v320_v5 = vmul.f32 %v318_v4, %v313_v1 }
 0x231   :  { %323 = vrot.lane.b32.xlu1 %v321_v3, %s987_s16 }
 0x2a3   :  { %v324_v6 = vpop.permute.xlu1 %323 }
 0x2a4   :  { %v326_v7 = vadd.f32 %v324_v6, %v320_v5 }
 0x2a6   :  { %860 = vtanh.f32 %v326_v7 }
 0x2ac   :  { %v861_v10 = vpop.eup %860 }
 0x2ad   :  { %v328_v11 = vmul.f32 %v861_v10, %v315_v9  ;;  %v76_v10 = vld [vmem:[#allocation4 + $0x20] sm:$0xff] }
 0x2ae   :  { %810 = vmatmul.msk.f32.gmra.mxu0 %vm102_vm0, %v76_v10  ;;  %818 = vmatmul.msk.f32.gmra.mxu1 %vm102_vm0, %v76_v10 }
 0x2af   :  { %330 = vrot.lane.b32.xlu2 %v328_v11, %s987_s16 }
 0x309   :  { %v331_v13 = vpop.permute.xlu2 %330 }
 0x30a   :  { %824 = vmatmul.msk.f32.vlgmr.msrb.gmra.mxu2 %vm102_vm0, %v331_v13  ;;  %825 = vmatmul.msk.f32.vlgmr.msrb.gmra.mxu3 %vm102_vm0, %v331_v13 }
 0x30b   :  { %470 = vmatpush.msrb.mxu2 %v1051_v32  ;;  %490 = vmatpush.msrb.mxu3 %v1053_v33 }
 0x30d   :  { %471 = vmatpush.msrb.mxu2 %v1055_v34  ;;  %491 = vmatpush.msrb.mxu3 %v1059_v35 }
 0x30f   :  { %472 = vmatpush.msrb.mxu2 %v1061_v36  ;;  %492 = vmatpush.msrb.mxu3 %v1063_v37 }
 0x311   :  { %473 = vmatpush.msrb.mxu2 %v1069_v38  ;;  %493 = vmatpush.msrb.mxu3 %v1071_v39 }
 0x313   :  { %474 = vmatpush.msrb.mxu2 %v1077_v40  ;;  %494 = vmatpush.msrb.mxu3 %v1079_v41 }
 0x315   :  { %475 = vmatpush.msrb.mxu2 %v1085_v42  ;;  %495 = vmatpush.msrb.mxu3 %v1087_v43 }
 0x317   :  { %476 = vmatpush.msrb.mxu2 %v1093_v44  ;;  %496 = vmatpush.msrb.mxu3 %v1095_v45 }
 0x319   :  { %477 = vmatpush.msrb.mxu2 %v1108_v50  ;;  %497 = vmatpush.msrb.mxu3 %v1110_v51 }
 0x38d   :  { %v351_v18 = vpop.f32.mrf.mxu2  ;;  %v371_v21 = vpop.f32.mrf.mxu3 }
 0x38e   :  { %v376_v22 = vadd.f32 %v351_v18, %v151_v16  ;;  %v377_v23 = vadd.f32 %v371_v21, %v192_v17 }
 0x390   :  { %862 = vtanh.f32 %v376_v22 }
 0x391   :  { %864 = vtanh.f32 %v377_v23 }
 0x396   :  { %v863_v24 = vpop.eup %862 }
 0x397   :  { %v380_v25 = vmul.f32 0.5, %v863_v24  ;;  %v865_v27 = vpop.eup %864 }
 0x398   :  { %v382_v46 = vmul.f32 0.5, %v865_v27 }
 0x399   :  { %v381_v26 = vadd.f32 0.5, %v380_v25 }
 0x39a   :  { %v383_v47 = vadd.f32 0.5, %v382_v46 }
 0x39b   :  { %v385_v28 = vmul.f32 %v865_v27, %v381_v26  ;;  %v384_v29 = vmul.f32 %v381_v26, %v326_v7 }
 0x39d   :  { %387 = vrot.lane.b32.xlu2 %v385_v28, %s987_s16 }
 0x3f7   :  { %v388_v30 = vpop.permute.xlu2 %387 }
 0x3f8   :  { %v390_v31 = vadd.f32 %v388_v30, %v384_v29 }
 0x3fa   :  { %866 = vtanh.f32 %v390_v31 }
 0x400   :  { %v867_v48 = vpop.eup %866 }
 0x401   :  { %v392_v49 = vmul.f32 %v867_v48, %v383_v47 }
 0x403   :  { %394 = vrot.lane.b32.xlu0 %v392_v49, %s987_s16 }
 0x475   :  { %v395_v53 = vpop.permute.xlu0 %394 }
 0x476   :  { %826 = vmatmul.msk.f32.vlgmr.msra.gmra.mxu2 %vm102_vm0, %v395_v53  ;;  %827 = vmatmul.msk.f32.vlgmr.msra.gmra.mxu3 %vm102_vm0, %v395_v53 }
 0x477   :  { %598 = vmatpush.msra.mxu2 %v1051_v32  ;;  %618 = vmatpush.msra.mxu3 %v1053_v33 }
 0x479   :  { %599 = vmatpush.msra.mxu2 %v1055_v34  ;;  %619 = vmatpush.msra.mxu3 %v1059_v35 }
 0x47b   :  { %600 = vmatpush.msra.mxu2 %v1061_v36  ;;  %620 = vmatpush.msra.mxu3 %v1063_v37 }
 0x47d   :  { %601 = vmatpush.msra.mxu2 %v1069_v38  ;;  %621 = vmatpush.msra.mxu3 %v1071_v39 }
 0x47f   :  { %602 = vmatpush.msra.mxu2 %v1077_v40  ;;  %622 = vmatpush.msra.mxu3 %v1079_v41 }
 0x481   :  { %603 = vmatpush.msra.mxu2 %v1085_v42  ;;  %623 = vmatpush.msra.mxu3 %v1087_v43 }
 0x483   :  { %604 = vmatpush.msra.mxu2 %v1093_v44  ;;  %624 = vmatpush.msra.mxu3 %v1095_v45 }
 0x485   :  { %605 = vmatpush.msra.mxu2 %v1108_v50  ;;  %625 = vmatpush.msra.mxu3 %v1110_v51 }
 0x4f9   :  { %v415_v58 = vpop.f32.mrf.mxu2  ;;  %v435_v59 = vpop.f32.mrf.mxu3 }
 0x4fa   :  { %v440_v60 = vadd.f32 %v415_v58, %v154_v56  ;;  %v441_v61 = vadd.f32 %v435_v59, %v195_v57 }
 0x4fc   :  { %868 = vtanh.f32 %v440_v60 }
 0x4fd   :  { %870 = vtanh.f32 %v441_v61 }
 0x502   :  { %v869_v62 = vpop.eup %868 }
 0x503   :  { %v444_v63 = vmul.f32 0.5, %v869_v62  ;;  %v871_v1 = vpop.eup %870 }
 0x504   :  { %v446_v6 = vmul.f32 0.5, %v871_v1 }
 0x505   :  { %v445_v0 = vadd.f32 0.5, %v444_v63 }
 0x506   :  { %v447_v7 = vadd.f32 0.5, %v446_v6 }
 0x507   :  { %v449_v2 = vmul.f32 %v871_v1, %v445_v0  ;;  %v448_v3 = vmul.f32 %v445_v0, %v390_v31 }
 0x509   :  { %451 = vrot.lane.b32.xlu1 %v449_v2, %s987_s16 }
 0x57b   :  { %v452_v4 = vpop.permute.xlu1 %451 }
 0x57c   :  { %v454_v5 = vadd.f32 %v452_v4, %v448_v3 }
 0x57e   :  { %872 = vtanh.f32 %v454_v5 }
 0x584   :  { %v873_v8 = vpop.eup %872 }
 0x585   :  { %v456_v9 = vmul.f32 %v873_v8, %v447_v7 }
 0x587   :  { %458 = vrot.lane.b32.xlu2 %v456_v9, %s987_s16 }
 0x5e1   :  { %v459_v11 = vpop.permute.xlu2 %458 }
 0x5e2   :  { %828 = vmatmul.msk.f32.vlgmr.msrb.gmra.mxu2 %vm102_vm0, %v459_v11  ;;  %829 = vmatmul.msk.f32.vlgmr.msrb.gmra.mxu3 %vm102_vm0, %v459_v11 }
 0x5e3   :  { %732 = vmatpush.msrb.mxu2 %v1051_v32  ;;  %752 = vmatpush.msrb.mxu3 %v1053_v33  ;;  %v156_v32 = vpop.f32.mrf.mxu0  ;;  %v197_v33 = vpop.f32.mrf.mxu1 }
 0x5e5   :  { %733 = vmatpush.msrb.mxu2 %v1055_v34  ;;  %753 = vmatpush.msrb.mxu3 %v1059_v35  ;;  %v157_v34 = vadd.f32 %v156_v32, %v1042_v19  ;;  %v198_v35 = vadd.f32 %v197_v33, %v1044_v20 }
 0x5e7   :  { %734 = vmatpush.msrb.mxu2 %v1061_v36  ;;  %754 = vmatpush.msrb.mxu3 %v1063_v37 }
 0x5e9   :  { %735 = vmatpush.msrb.mxu2 %v1069_v38  ;;  %755 = vmatpush.msrb.mxu3 %v1071_v39 }
 0x5eb   :  { %736 = vmatpush.msrb.mxu2 %v1077_v40  ;;  %756 = vmatpush.msrb.mxu3 %v1079_v41 }
 0x5ed   :  { %737 = vmatpush.msrb.mxu2 %v1085_v42  ;;  %757 = vmatpush.msrb.mxu3 %v1087_v43 }
 0x5ef   :  { %738 = vmatpush.msrb.mxu2 %v1093_v44  ;;  %758 = vmatpush.msrb.mxu3 %v1095_v45  ;;  %v77_v45 = vld [vmem:[#allocation4 + $0x28] sm:$0xff] }
 0x5f0   :  { %811 = vmatmul.msk.f32.gmra.mxu0 %vm102_vm0, %v77_v45  ;;  %819 = vmatmul.msk.f32.gmra.mxu1 %vm102_vm0, %v77_v45 }
 0x5f1   :  { %739 = vmatpush.msrb.mxu2 %v1108_v50  ;;  %759 = vmatpush.msrb.mxu3 %v1110_v51  ;;  %v78_v50 = vld [vmem:[#allocation4 + $0x30] sm:$0xff]  ;;  %v79_v51 = vld [vmem:[#allocation4 + $0x38] sm:$0xff] }
 0x5f8   :  { %812 = vmatmul.msk.f32.gmra.mxu0 %vm102_vm0, %v78_v50  ;;  %820 = vmatmul.msk.f32.gmra.mxu1 %vm102_vm0, %v78_v50 }
 0x600   :  { %813 = vmatmul.msk.f32.gmra.mxu0 %vm102_vm0, %v79_v51  ;;  %821 = vmatmul.msk.f32.gmra.mxu1 %vm102_vm0, %v79_v51 }
 0x665   :  { %v479_v36 = vpop.f32.mrf.mxu2  ;;  %v499_v37 = vpop.f32.mrf.mxu3 }
 0x666   :  { %v504_v38 = vadd.f32 %v479_v36, %v157_v34  ;;  %v505_v39 = vadd.f32 %v499_v37, %v198_v35 }
 0x668   :  { %874 = vtanh.f32 %v504_v38 }
 0x669   :  { %876 = vtanh.f32 %v505_v39 }
 0x66d   :  { %v159_v22 = vpop.f32.mrf.mxu0  ;;  %v200_v23 = vpop.f32.mrf.mxu1 }
 0x66e   :  { %v875_v40 = vpop.eup %874  ;;  %v160_v28 = vadd.f32 %v159_v22, %v1042_v19  ;;  %v201_v31 = vadd.f32 %v200_v23, %v1044_v20  ;;  %v713_v22 = vld [vmem:[%s1284_s2] sm:$0x3]  ;;  %s989_s2 = smov 32  }
 0x66f   :  { %v508_v41 = vmul.f32 0.5, %v875_v40  ;;  %v877_v43 = vpop.eup %876  ;;  %v715_v23 = vperm.slane %v713_v22, 0 }
 0x670   :  { %v510_v15 = vmul.f32 0.5, %v877_v43 }
 0x671   :  { %v509_v42 = vadd.f32 0.5, %v508_v41 }
 0x672   :  { %v511_v16 = vadd.f32 0.5, %v510_v15 }
 0x673   :  { %v513_v44 = vmul.f32 %v877_v43, %v509_v42  ;;  %v512_v12 = vmul.f32 %v509_v42, %v454_v5 }
 0x675   :  { %515 = vrot.lane.b32.xlu0 %v513_v44, %s987_s16  ;;  %v162_v24 = vpop.f32.mrf.mxu0  ;;  %v203_v25 = vpop.f32.mrf.mxu1 }
 0x676   :  { %v163_v63 = vadd.f32 %v162_v24, %v1042_v19  ;;  %v204_v2 = vadd.f32 %v203_v25, %v1044_v20  ;;  %v716_v24 = vperm.slane %v713_v22, 1 }
 0x67d   :  { %v165_v26 = vpop.f32.mrf.mxu0  ;;  %v206_v27 = vpop.f32.mrf.mxu1 }
 0x67e   :  { %v166_v38 = vadd.f32 %v165_v26, %v1042_v19  ;;  %v207_v41 = vadd.f32 %v206_v27, %v1044_v20 }
 0x6e7   :  { %v516_v13 = vpop.permute.xlu0 %515 }
 0x6e8   :  { %v518_v14 = vadd.f32 %v516_v13, %v512_v12 }
 0x6ea   :  { %878 = vtanh.f32 %v518_v14 }
 0x6f0   :  { %v879_v17 = vpop.eup %878 }
 0x6f1   :  { %v520_v18 = vmul.f32 %v879_v17, %v511_v16 }
 0x6f3   :  { %522 = vrot.lane.b32.xlu1 %v520_v18, %s987_s16 }
 0x765   :  { %v523_v21 = vpop.permute.xlu1 %522 }
 0x766   :  { %830 = vmatmul.msk.f32.vlgmr.msrb.gmra.mxu0 %vm102_vm0, %v523_v21  ;;  %831 = vmatmul.msk.f32.vlgmr.msrb.gmra.mxu1 %vm102_vm0, %v523_v21  ;;  %v848_v21 = vld [vmem:[%s1286_s4] ss:$0 sm:$0xff] }
 0x7e3   :  { %v543_v29 = vpop.f32.mrf.mxu0  ;;  %v563_v30 = vpop.f32.mrf.mxu1 }
 0x7e4   :  { %v568_v46 = vadd.f32 %v543_v29, %v160_v28  ;;  %v569_v47 = vadd.f32 %v563_v30, %v201_v31 }
 0x7e6   :  { %880 = vtanh.f32 %v568_v46 }
 0x7e7   :  { %882 = vtanh.f32 %v569_v47 }
 0x7ec   :  { %v881_v48 = vpop.eup %880 }
 0x7ed   :  { %v572_v49 = vmul.f32 0.5, %v881_v48  ;;  %v883_v53 = vpop.eup %882 }
 0x7ee   :  { %v574_v58 = vmul.f32 0.5, %v883_v53 }
 0x7ef   :  { %v573_v52 = vadd.f32 0.5, %v572_v49 }
 0x7f0   :  { %v575_v59 = vadd.f32 0.5, %v574_v58 }
 0x7f1   :  { %v577_v54 = vmul.f32 %v883_v53, %v573_v52  ;;  %v576_v55 = vmul.f32 %v573_v52, %v518_v14 }
 0x7f3   :  { %579 = vrot.lane.b32.xlu2 %v577_v54, %s987_s16 }
 0x84d   :  { %v580_v56 = vpop.permute.xlu2 %579 }
 0x84e   :  { %v582_v57 = vadd.f32 %v580_v56, %v576_v55 }
 0x850   :  { %884 = vtanh.f32 %v582_v57 }
 0x856   :  { %v885_v60 = vpop.eup %884 }
 0x857   :  { %v584_v61 = vmul.f32 %v885_v60, %v575_v59 }
 0x859   :  { %586 = vrot.lane.b32.xlu0 %v584_v61, %s987_s16  ;;  %v849_v61 = vld [vmem:[#allocation3] ss:$0 sm:$0xff] }
 0x8cb   :  { %v587_v62 = vpop.permute.xlu0 %586 }
 0x8cc   :  { %832 = vmatmul.msk.f32.vlgmr.msra.gmra.mxu2 %vm102_vm0, %v587_v62  ;;  %833 = vmatmul.msk.f32.vlgmr.msra.gmra.mxu3 %vm102_vm0, %v587_v62 }
 0x94f   :  { %v607_v0 = vpop.f32.mrf.mxu2  ;;  %v627_v1 = vpop.f32.mrf.mxu3 }
 0x950   :  { %v632_v3 = vadd.f32 %v607_v0, %v163_v63  ;;  %v633_v4 = vadd.f32 %v627_v1, %v204_v2 }
 0x952   :  { %886 = vtanh.f32 %v632_v3 }
 0x953   :  { %888 = vtanh.f32 %v633_v4 }
 0x958   :  { %v887_v5 = vpop.eup %886 }
 0x959   :  { %v636_v6 = vmul.f32 0.5, %v887_v5  ;;  %v889_v8 = vpop.eup %888 }
 0x95a   :  { %v638_v33 = vmul.f32 0.5, %v889_v8 }
 0x95b   :  { %v637_v7 = vadd.f32 0.5, %v636_v6 }
 0x95c   :  { %v639_v34 = vadd.f32 0.5, %v638_v33 }
 0x95d   :  { %v641_v9 = vmul.f32 %v889_v8, %v637_v7  ;;  %v640_v10 = vmul.f32 %v637_v7, %v582_v57 }
 0x95f   :  { %643 = vrot.lane.b32.xlu1 %v641_v9, %s987_s16 }
 0x9d1   :  { %v644_v11 = vpop.permute.xlu1 %643 }
 0x9d2   :  { %v646_v32 = vadd.f32 %v644_v11, %v640_v10 }
 0x9d4   :  { %890 = vtanh.f32 %v646_v32 }
 0x9da   :  { %v891_v35 = vpop.eup %890 }
 0x9db   :  { %v648_v36 = vmul.f32 %v891_v35, %v639_v34 }
 0x9dd   :  { %650 = vrot.lane.b32.xlu2 %v648_v36, %s987_s16 }
 0xa37   :  { %v651_v37 = vpop.permute.xlu2 %650 }
 0xa38   :  { %834 = vmatmul.msk.f32.vlgmr.msra.gmra.mxu0 %vm102_vm0, %v651_v37  ;;  %835 = vmatmul.msk.f32.vlgmr.msra.gmra.mxu1 %vm102_vm0, %v651_v37 }
 0xab5   :  { %v671_v39 = vpop.f32.mrf.mxu0  ;;  %v691_v40 = vpop.f32.mrf.mxu1 }
 0xab6   :  { %v696_v42 = vadd.f32 %v671_v39, %v166_v38  ;;  %v697_v43 = vadd.f32 %v691_v40, %v207_v41 }
 0xab8   :  { %892 = vtanh.f32 %v696_v42 }
 0xab9   :  { %894 = vtanh.f32 %v697_v43 }
 0xabe   :  { %v893_v44 = vpop.eup %892 }
 0xabf   :  { %v700_v45 = vmul.f32 0.5, %v893_v44  ;;  %v895_v51 = vpop.eup %894 }
 0xac0   :  { %v702_v19 = vmul.f32 0.5, %v895_v51 }
 0xac1   :  { %v701_v50 = vadd.f32 0.5, %v700_v45 }
 0xac2   :  { %v703_v16 = vadd.f32 0.5, %v702_v19 }
 0xac3   :  { %v705_v12 = vmul.f32 %v895_v51, %v701_v50  ;;  %v704_v13 = vmul.f32 %v701_v50, %v646_v32 }
 0xac5   :  { %707 = vrot.lane.b32.xlu0 %v705_v12, %s987_s16 }
 0xacd   :  { %782 = vrot.lane.b32.xlu0 %v848_v21, %s988_s19 }
 0xb37   :  { %v708_v14 = vpop.permute.xlu0 %707 }
 0xb38   :  { %v710_v15 = vadd.f32 %v708_v14, %v704_v13 }
 0xb3a   :  { %896 = vtanh.f32 %v710_v15 }
 0xb3f   :  { %v783_v56 = vpop.permute.xlu0 %782 }
 0xb40   :  { %v897_v17 = vpop.eup %896 }
 0xb41   :  { %v712_v18 = vmul.f32 %v897_v17, %v703_v16 }
 0xb43   :  { %720 = vrot.lane.b32.xlu1 %v712_v18, %s987_s16 }
 0xbb5   :  { %v721_v20 = vpop.permute.xlu1 %720 }
 0xbb6   :  { %836 = vmatmul.msk.f32.vlgmr.msrb.gmra.mxu2 %vm102_vm0, %v721_v20  ;;  %837 = vmatmul.msk.f32.vlgmr.msrb.gmra.mxu3 %vm102_vm0, %v721_v20 }
 0xc39   :  { %v741_v25 = vpop.f32.mrf.mxu2  ;;  %v761_v26 = vpop.f32.mrf.mxu3 }
 0xc3a   :  { %v742_v27 = vadd.f32 %v741_v25, %v715_v23  ;;  %v762_v28 = vadd.f32 %v761_v26, %v716_v24 }
 0xc3c   :  { %898 = vtanh.f32 %v742_v27 }
 0xc3d   :  { %900 = vtanh.f32 %v762_v28 }
 0xc42   :  { %v899_v29 = vpop.eup %898 }
 0xc43   :  { %v766_v30 = vmul.f32 0.5, %v899_v29  ;;  %v901_v46 = vpop.eup %900 }
 0xc44   :  { %v768_v53 = vmul.f32 0.5, %v901_v46 }
 0xc45   :  { %v767_v31 = vadd.f32 0.5, %v766_v30 }
 0xc46   :  { %v769_v54 = vadd.f32 0.5, %v768_v53 }
 0xc47   :  { %v771_v47 = vmul.f32 %v901_v46, %v767_v31  ;;  %v770_v48 = vmul.f32 %v767_v31, %v710_v15 }
 0xc49   :  { %773 = vrot.lane.b32.xlu2 %v771_v47, %s987_s16 }
 0xca3   :  { %v774_v49 = vpop.permute.xlu2 %773 }
 0xca4   :  { %v776_v52 = vadd.f32 %v774_v49, %v770_v48 }
 0xca6   :  { %902 = vtanh.f32 %v776_v52 }
 0xcac   :  { %v903_v55 = vpop.eup %902 }
 0xcad   :  { %v778_v57 = vmul.f32 %v903_v55, %v769_v54 }
 0xcaf   :  { %v785_v58 = vmul.f32 %v783_v56, %v778_v57 }
 0xcb1   :  { %787 = vrot.lane.b32.xlu1 %v785_v58, %s989_s2 }
 0xd23   :  { %v788_v59 = vpop.permute.xlu1 %787 }
 0xd24   :  { %v790_v60 = vsel %vm256_vm1, %v788_v59, 0.0 }
 0xd25   :  { %791 = vadd.xlane.f32.xlu2 %v790_v60 }
 0xd98   :  { %v792_v62 = vpop.xlane.xlu2 %791 }
 0xd99   :  { %v797_v63 = vadd.f32 %v849_v61, %v792_v62 }
 0xd9b   :  { %799 = vst.msk [vmem:[%s1288_s6] sm:$0xff] %vm798_vm2, %v797_v63 }
 0xd9c   :  { %804 = vsyncpa [#allocation5], 1 }
 0xd9d   :  { %805 = vsyncpa [#allocation7], 1 }

</bundles_post_ra>
